<compile_context>
chip_gen: v6e
topology: v6e:2x2x1
jax: 0.10.0
libtpu: 0.0.40
codegen_flags: <defaults>
</compile_context>

<pallas_src>
import jax
import jax.numpy as jnp
from jax.experimental import pallas as pl
from jax.experimental.pallas import tpu as pltpu

# ---- scaled-down config (original: N=350, T=24, hid=8, fc hidden=512, 12 out steps)
B = 2            # batch
N = 16           # nodes            (orig 350)
T = 8            # input timesteps  (orig 24)
C = 8            # hid_dim
F = 32           # fc hidden        (orig 512)
OUT_STEPS = 4    # predicted steps  (orig 12)
NT = N * T       # 128  -> lane-aligned flattened (node, time) axis
L = B * NT       # 256  -> batch folded onto lanes
D = C * NT       # flattened feature size into the fc (torch Flatten order, per batch)
O = N * OUT_STEPS
OPAD = 128       # lane-dense padded fc output width (O = 64 < 128)
SLAB_W = 256     # packed small-parameter slab width (lane multiple of 128)


def stgcn_fused_kernel(x_ref, gate_ref, slab_ref, fcw1_ref, fcw2_ref, out_ref):
    # ---- static views into the packed parameter slab (one DMA for ~10 small params)
    slab = slab_ref[...]                                         # (C, SLAB_W) f32
    w1a   = slab[:, 0:3]                                         # Conv2d(1,C,(1,3)) taps
    b1a   = slab[:, 3:4]
    w1b   = slab[:, 4:4 + C]                                     # 1x1 conv
    b1b   = slab[:, 12:13]
    w2a_p = slab[:, 16:16 + C]                                   # (1,3) conv tap t-1
    w2a_c = slab[:, 24:24 + C]                                   # tap t
    w2a_n = slab[:, 32:32 + C]                                   # tap t+1
    b2a   = slab[:, 40:41]
    w2b   = slab[:, 48:48 + C]
    b2b   = slab[:, 56:57]
    fcb1  = slab[0:B, 64:64 + F]                                 # (B, F)    (rows replicated)
    fcb2  = slab[0:B, 128:128 + OPAD]                            # (B, OPAD) (zero past O)

    # Lane index layout everywhere: j = b*N*T + n*T + t.
    # ---- shared temporal-boundary masks, built ONCE
    lane_t = jax.lax.broadcasted_iota(jnp.int32, (1, L), 1) % T
    first_t = lane_t == 0        # the "previous timestep" tap is zero padding here
    last_t = lane_t == T - 1     # the "next timestep" tap is zero padding here

    def shift_prev(a):           # a[:, j-1], zeroed at t == 0 (also kills batch/node wrap)
        return jnp.where(first_t, 0.0, pltpu.roll(a, 1, 1))

    def shift_next(a):           # a[:, j+1], zeroed at t == T-1
        return jnp.where(last_t, 0.0, pltpu.roll(a, L - 1, 1))

    x = x_ref[...]                                               # (1, L)

    # ---- block1: Conv2d(1,C,(1,3)) as 3 broadcast VPU FMAs + ReLU, then 1x1 conv + ReLU
    h1 = (w1a[:, 0:1] * shift_prev(x)
          + w1a[:, 1:2] * x
          + w1a[:, 2:3] * shift_next(x)
          + b1a)                                                 # (C, L)
    h1 = jnp.maximum(h1, 0.0)
    out1 = jnp.maximum(
        jnp.dot(w1b, h1, preferred_element_type=jnp.float32) + b1b, 0.0)   # (C, L)

    # ---- block2: Conv2d(C,C,(1,3)) as 3 accumulated (C,C)x(C,L) MXU dots (no (3C,L) concat)
    h2 = (jnp.dot(w2a_p, shift_prev(out1), preferred_element_type=jnp.float32)
          + jnp.dot(w2a_c, out1, preferred_element_type=jnp.float32)
          + jnp.dot(w2a_n, shift_next(out1), preferred_element_type=jnp.float32)
          + b2a)                                                 # (C, L)
    h2 = jnp.maximum(h2, 0.0)
    out2 = jnp.maximum(
        jnp.dot(w2b, h2, preferred_element_type=jnp.float32) + b2b, 0.0)   # (C, L)

    # ---- temporal gate: pre-broadcast to (C, L) on the host, pure VPU multiply here
    res = (out1 + out2) * gate_ref[...]                          # (C, L)

    # ---- fc1 as a C-batched bmm: fc_w1 reshaped (C, NT, F) on the host folds the torch
    #      flatten order into the weight layout, so no torch-order flatten relayout is
    #      needed in-kernel; bf16 weight stream, f32 accumulate, sublane sum over C.
    res3 = res.reshape(C, B, NT).astype(jnp.bfloat16)            # one small lane-split
    hparts = jnp.einsum('cbn,cnf->cbf', res3, fcw1_ref[...],
                        preferred_element_type=jnp.float32)      # (C, B, F)
    h = jnp.maximum(jnp.sum(hparts, axis=0) + fcb1, 0.0)         # (B, F)

    # ---- fc2: bf16 weights, lane-dense padded (B, OPAD) store
    out_ref[...] = (jnp.dot(h.astype(jnp.bfloat16), fcw2_ref[...],
                            preferred_element_type=jnp.float32) + fcb2)    # (B, OPAD)


def _pack_param_slab(params):
    """All small parameters in one (C, SLAB_W) f32 operand (one DMA instead of ~10)."""
    slab = jnp.zeros((C, SLAB_W), jnp.float32)
    slab = slab.at[:, 0:3].set(params['w1a'][:, 0, :])
    slab = slab.at[:, 3:4].set(params['b1a'][:, None])
    slab = slab.at[:, 4:4 + C].set(params['w1b'])
    slab = slab.at[:, 12:13].set(params['b1b'][:, None])
    slab = slab.at[:, 16:16 + C].set(params['w2a'][:, :, 0])
    slab = slab.at[:, 24:24 + C].set(params['w2a'][:, :, 1])
    slab = slab.at[:, 32:32 + C].set(params['w2a'][:, :, 2])
    slab = slab.at[:, 40:41].set(params['b2a'][:, None])
    slab = slab.at[:, 48:48 + C].set(params['w2b'])
    slab = slab.at[:, 56:57].set(params['b2b'][:, None])
    slab = slab.at[:, 64:64 + F].set(jnp.broadcast_to(params['fc_b1'][None, :], (C, F)))
    slab = slab.at[:, 128:128 + O].set(jnp.broadcast_to(params['fc_b2'][None, :], (C, O)))
    return slab


@jax.jit
def stgcn_forward(x, t, params):
    # host-side glue: cheap reshapes / broadcasts that XLA fuses into the operand feed
    x_flat = x.reshape(1, L).astype(jnp.float32)                 # lanes = b*NT + n*T + t

    # gate[c, b*NT + n*T + tt] = t[b, tt, c]  (broadcast over nodes, done outside the kernel)
    gate = jnp.broadcast_to(jnp.transpose(t, (2, 0, 1))[:, :, None, :],
                            (C, B, N, T)).reshape(C, L).astype(jnp.float32)

    slab = _pack_param_slab(params)

    # bf16 fc weight stream (f32 accumulation in-kernel); fc_w1 laid out (C, NT, F) so the
    # torch flatten order is absorbed into the weight layout; fc_w2 lane-padded to OPAD.
    fcw1 = params['fc_w1'].reshape(C, NT, F).astype(jnp.bfloat16)
    fcw2 = (jnp.zeros((F, OPAD), jnp.float32).at[:, :O].set(params['fc_w2'])
            .astype(jnp.bfloat16))

    vmem = pl.BlockSpec(memory_space=pltpu.MemorySpace.VMEM)
    out_pad = pl.pallas_call(
        stgcn_fused_kernel,
        out_shape=jax.ShapeDtypeStruct((B, OPAD), jnp.float32),
        in_specs=[vmem] * 5,
        out_specs=vmem,
    )(x_flat, gate, slab, fcw1, fcw2)

    return out_pad[:, :O].reshape(B, N, OUT_STEPS)


def init_params(key):
    ks = jax.random.split(key, 12)

    def u(k, shape, fan_in):
        bound = 1.0 / (fan_in ** 0.5)
        return jax.random.uniform(k, shape, jnp.float32, -bound, bound)

    return dict(
        w1a=u(ks[0], (C, 1, 3), 3),        # Conv2d(1, C, (1,3)) weight (kH squeezed)
        b1a=u(ks[1], (C,), 3),
        w1b=u(ks[2], (C, C), C),           # Conv2d(C, C, (1,1)) weight
        b1b=u(ks[3], (C,), C),
        w2a=u(ks[4], (C, C, 3), 3 * C),    # Conv2d(C, C, (1,3)) weight
        b2a=u(ks[5], (C,), 3 * C),
        w2b=u(ks[6], (C, C), C),
        b2b=u(ks[7], (C,), C),
        fc_w1=u(ks[8], (D, F), D),         # Linear(D, F) stored as (in, out)
        fc_b1=u(ks[9], (F,), D),
        fc_w2=u(ks[10], (F, O), F),
        fc_b2=u(ks[11], (O,), F),
    )


def reference_forward(x, t, params):
    """Pure-JAX reference mirroring the PyTorch forward semantics."""
    xb = x[:, None, :, :]                                            # (B,1,N,T)

    def conv1x3(inp, w, b):
        pad = jnp.pad(inp, ((0, 0), (0, 0), (0, 0), (1, 1)))
        out = 0.0
        for k in range(3):
            out = out + jnp.einsum('oi,bint->bont', w[:, :, k], pad[..., k:k + T])
        return out + b[None, :, None, None]

    def conv1x1(inp, w, b):
        return jnp.einsum('oi,bint->bont', w, inp) + b[None, :, None, None]

    h = jax.nn.relu(conv1x3(xb, params['w1a'], params['b1a']))
    out1 = jax.nn.relu(conv1x1(h, params['w1b'], params['b1b']))
    h = jax.nn.relu(conv1x3(out1, params['w2a'], params['b2a']))
    out2 = jax.nn.relu(conv1x1(h, params['w2b'], params['b2b']))
    res = (out1 + out2) * jnp.transpose(t, (0, 2, 1))[:, :, None, :]  # gate over nodes
    flat = res.reshape(B, D)
    h = jax.nn.relu(flat @ params['fc_w1'] + params['fc_b1'])
    return (h @ params['fc_w2'] + params['fc_b2']).reshape(B, N, OUT_STEPS)


if __name__ == "__main__":
    # NOTE: `adj` from __init__ is never used by the PyTorch forward, so it is omitted.
    key = jax.random.PRNGKey(0)
    kx, kt, kp = jax.random.split(key, 3)
    x = jax.random.normal(kx, (B, N, T), jnp.float32)
    t = jax.random.normal(kt, (B, T, C), jnp.float32)
    params = init_params(kp)

    out = jax.block_until_ready(stgcn_forward(x, t, params))
    ref = reference_forward(x, t, params)
    assert out.shape == (B, N, OUT_STEPS)
    if not jnp.allclose(out, ref, atol=5e-2, rtol=5e-2):
        raise AssertionError("Pallas output mismatches JAX reference")
    print("KERNEL_OK")
</pallas_src>

<mosaic_0001>
module attributes {stable_mosaic.version = 11 : i64} {
  func.func @stgcn_fused_kernel(%arg0: memref<1x256xf32, #tpu.memory_space<vmem>>, %arg1: memref<8x256xf32, #tpu.memory_space<vmem>>, %arg2: memref<8x256xf32, #tpu.memory_space<vmem>>, %arg3: memref<8x128x32xbf16, #tpu.memory_space<vmem>>, %arg4: memref<32x128xbf16, #tpu.memory_space<vmem>>, %arg5: memref<2x128xf32, #tpu.memory_space<vmem>>) attributes {dimension_semantics = [], scalar_prefetch = 0 : i64, scratch_operands = 0 : i64, tpu.core_type = #tpu.core_type<tc>} {
    %c0 = arith.constant 0 : index
    %c0_0 = arith.constant 0 : index
    %0 = vector.load %arg2[%c0, %c0_0] : memref<8x256xf32, #tpu.memory_space<vmem>>, vector<8x256xf32>
    %1 = vector.extract_strided_slice %0 {offsets = [0, 0], sizes = [8, 3], strides = [1, 1]} : vector<8x256xf32> to vector<8x3xf32>
    %2 = vector.extract_strided_slice %0 {offsets = [0, 3], sizes = [8, 1], strides = [1, 1]} : vector<8x256xf32> to vector<8x1xf32>
    %3 = vector.extract_strided_slice %0 {offsets = [0, 4], sizes = [8, 8], strides = [1, 1]} : vector<8x256xf32> to vector<8x8xf32>
    %4 = vector.extract_strided_slice %0 {offsets = [0, 12], sizes = [8, 1], strides = [1, 1]} : vector<8x256xf32> to vector<8x1xf32>
    %5 = vector.extract_strided_slice %0 {offsets = [0, 16], sizes = [8, 8], strides = [1, 1]} : vector<8x256xf32> to vector<8x8xf32>
    %6 = vector.extract_strided_slice %0 {offsets = [0, 24], sizes = [8, 8], strides = [1, 1]} : vector<8x256xf32> to vector<8x8xf32>
    %7 = vector.extract_strided_slice %0 {offsets = [0, 32], sizes = [8, 8], strides = [1, 1]} : vector<8x256xf32> to vector<8x8xf32>
    %8 = vector.extract_strided_slice %0 {offsets = [0, 40], sizes = [8, 1], strides = [1, 1]} : vector<8x256xf32> to vector<8x1xf32>
    %9 = vector.extract_strided_slice %0 {offsets = [0, 48], sizes = [8, 8], strides = [1, 1]} : vector<8x256xf32> to vector<8x8xf32>
    %10 = vector.extract_strided_slice %0 {offsets = [0, 56], sizes = [8, 1], strides = [1, 1]} : vector<8x256xf32> to vector<8x1xf32>
    %11 = vector.extract_strided_slice %0 {offsets = [0, 64], sizes = [2, 32], strides = [1, 1]} : vector<8x256xf32> to vector<2x32xf32>
    %12 = vector.extract_strided_slice %0 {offsets = [0, 128], sizes = [2, 128], strides = [1, 1]} : vector<8x256xf32> to vector<2x128xf32>
    %13 = tpu.iota {dimensions = array<i32: 1>} : vector<1x256xi32>
    %c8_i32 = arith.constant 8 : i32
    %c0_i32 = arith.constant 0 : i32
    %14 = arith.cmpi eq, %c8_i32, %c0_i32 : i32
    %c1_i32 = arith.constant 1 : i32
    %15 = arith.select %14, %c1_i32, %c8_i32 : i32
    %16 = vector.broadcast %15 : i32 to vector<1x256xi32>
    %17 = arith.remsi %13, %16 : vector<1x256xi32>
    %c0_i32_1 = arith.constant 0 : i32
    %18 = vector.broadcast %c0_i32_1 : i32 to vector<1x256xi32>
    %19 = arith.cmpi ne, %17, %18 : vector<1x256xi32>
    %c0_i32_2 = arith.constant 0 : i32
    %20 = vector.broadcast %c0_i32_2 : i32 to vector<1x256xi32>
    %21 = arith.cmpi slt, %17, %20 : vector<1x256xi32>
    %c0_i32_3 = arith.constant 0 : i32
    %22 = arith.cmpi slt, %15, %c0_i32_3 : i32
    %23 = vector.broadcast %22 : i1 to vector<1x256xi1>
    %24 = vector.broadcast %23 : vector<1x256xi1> to vector<1x256xi1>
    %25 = arith.xori %21, %24 : vector<1x256xi1>
    %26 = arith.andi %25, %19 : vector<1x256xi1>
    %27 = vector.broadcast %15 : i32 to vector<1x256xi32>
    %28 = arith.addi %17, %27 : vector<1x256xi32>
    %29 = arith.select %26, %28, %17 : vector<1x256xi1>, vector<1x256xi32>
    %c0_i32_4 = arith.constant 0 : i32
    %30 = vector.broadcast %c0_i32_4 : i32 to vector<1x256xi32>
    %31 = arith.cmpi eq, %29, %30 : vector<1x256xi32>
    %c7_i32 = arith.constant 7 : i32
    %32 = vector.broadcast %c7_i32 : i32 to vector<1x256xi32>
    %33 = arith.cmpi eq, %29, %32 : vector<1x256xi32>
    %c0_5 = arith.constant 0 : index
    %c0_6 = arith.constant 0 : index
    %34 = vector.load %arg0[%c0_5, %c0_6] : memref<1x256xf32, #tpu.memory_space<vmem>>, vector<1x256xf32>
    %35 = vector.extract_strided_slice %1 {offsets = [0, 0], sizes = [8, 1], strides = [1, 1]} : vector<8x3xf32> to vector<8x1xf32>
    %c1_i32_7 = arith.constant 1 : i32
    %36 = tpu.dynamic_rotate %34 by %c1_i32_7 dim 1 : vector<1x256xf32>, i32 -> vector<1x256xf32>
    %cst = arith.constant 0.000000e+00 : f32
    %37 = vector.broadcast %cst : f32 to vector<1x256xf32>
    %38 = arith.select %31, %37, %36 : vector<1x256xi1>, vector<1x256xf32>
    %39 = vector.broadcast %35 : vector<8x1xf32> to vector<8x256xf32>
    %40 = vector.broadcast %38 : vector<1x256xf32> to vector<8x256xf32>
    %41 = arith.mulf %39, %40 : vector<8x256xf32>
    %42 = vector.extract_strided_slice %1 {offsets = [0, 1], sizes = [8, 1], strides = [1, 1]} : vector<8x3xf32> to vector<8x1xf32>
    %43 = vector.broadcast %42 : vector<8x1xf32> to vector<8x256xf32>
    %44 = vector.broadcast %34 : vector<1x256xf32> to vector<8x256xf32>
    %45 = arith.mulf %43, %44 : vector<8x256xf32>
    %46 = arith.addf %41, %45 : vector<8x256xf32>
    %47 = vector.extract_strided_slice %1 {offsets = [0, 2], sizes = [8, 1], strides = [1, 1]} : vector<8x3xf32> to vector<8x1xf32>
    %c255_i32 = arith.constant 255 : i32
    %48 = tpu.dynamic_rotate %34 by %c255_i32 dim 1 : vector<1x256xf32>, i32 -> vector<1x256xf32>
    %cst_8 = arith.constant 0.000000e+00 : f32
    %49 = vector.broadcast %cst_8 : f32 to vector<1x256xf32>
    %50 = arith.select %33, %49, %48 : vector<1x256xi1>, vector<1x256xf32>
    %51 = vector.broadcast %47 : vector<8x1xf32> to vector<8x256xf32>
    %52 = vector.broadcast %50 : vector<1x256xf32> to vector<8x256xf32>
    %53 = arith.mulf %51, %52 : vector<8x256xf32>
    %54 = arith.addf %46, %53 : vector<8x256xf32>
    %55 = vector.broadcast %2 : vector<8x1xf32> to vector<8x256xf32>
    %56 = arith.addf %54, %55 : vector<8x256xf32>
    %cst_9 = arith.constant 0.000000e+00 : f32
    %57 = vector.broadcast %cst_9 : f32 to vector<8x256xf32>
    %58 = arith.maximumf %56, %57 : vector<8x256xf32>
    %cst_10 = arith.constant dense<0.000000e+00> : vector<8x256xf32>
    %59 = tpu.matmul %3, %58, %cst_10 {dimension_numbers = #tpu.dot_dimension_numbers<[1], [0], [0], [1], [0, 0, 1, 1], [], []>} : vector<8x8xf32>, vector<8x256xf32>, vector<8x256xf32> -> vector<8x256xf32>
    %60 = vector.broadcast %4 : vector<8x1xf32> to vector<8x256xf32>
    %61 = arith.addf %59, %60 : vector<8x256xf32>
    %cst_11 = arith.constant 0.000000e+00 : f32
    %62 = vector.broadcast %cst_11 : f32 to vector<8x256xf32>
    %63 = arith.maximumf %61, %62 : vector<8x256xf32>
    %c1_i32_12 = arith.constant 1 : i32
    %64 = tpu.dynamic_rotate %63 by %c1_i32_12 dim 1 : vector<8x256xf32>, i32 -> vector<8x256xf32>
    %cst_13 = arith.constant 0.000000e+00 : f32
    %65 = vector.shape_cast %31 : vector<1x256xi1> to vector<1x256xi1>
    %66 = vector.broadcast %65 : vector<1x256xi1> to vector<8x256xi1>
    %67 = vector.broadcast %cst_13 : f32 to vector<8x256xf32>
    %68 = arith.select %66, %67, %64 : vector<8x256xi1>, vector<8x256xf32>
    %cst_14 = arith.constant dense<0.000000e+00> : vector<8x256xf32>
    %69 = tpu.matmul %5, %68, %cst_14 {dimension_numbers = #tpu.dot_dimension_numbers<[1], [0], [0], [1], [0, 0, 1, 1], [], []>} : vector<8x8xf32>, vector<8x256xf32>, vector<8x256xf32> -> vector<8x256xf32>
    %cst_15 = arith.constant dense<0.000000e+00> : vector<8x256xf32>
    %70 = tpu.matmul %6, %63, %cst_15 {dimension_numbers = #tpu.dot_dimension_numbers<[1], [0], [0], [1], [0, 0, 1, 1], [], []>} : vector<8x8xf32>, vector<8x256xf32>, vector<8x256xf32> -> vector<8x256xf32>
    %71 = arith.addf %69, %70 : vector<8x256xf32>
    %c255_i32_16 = arith.constant 255 : i32
    %72 = tpu.dynamic_rotate %63 by %c255_i32_16 dim 1 : vector<8x256xf32>, i32 -> vector<8x256xf32>
    %cst_17 = arith.constant 0.000000e+00 : f32
    %73 = vector.shape_cast %33 : vector<1x256xi1> to vector<1x256xi1>
    %74 = vector.broadcast %73 : vector<1x256xi1> to vector<8x256xi1>
    %75 = vector.broadcast %cst_17 : f32 to vector<8x256xf32>
    %76 = arith.select %74, %75, %72 : vector<8x256xi1>, vector<8x256xf32>
    %cst_18 = arith.constant dense<0.000000e+00> : vector<8x256xf32>
    %77 = tpu.matmul %7, %76, %cst_18 {dimension_numbers = #tpu.dot_dimension_numbers<[1], [0], [0], [1], [0, 0, 1, 1], [], []>} : vector<8x8xf32>, vector<8x256xf32>, vector<8x256xf32> -> vector<8x256xf32>
    %78 = arith.addf %71, %77 : vector<8x256xf32>
    %79 = vector.broadcast %8 : vector<8x1xf32> to vector<8x256xf32>
    %80 = arith.addf %78, %79 : vector<8x256xf32>
    %cst_19 = arith.constant 0.000000e+00 : f32
    %81 = vector.broadcast %cst_19 : f32 to vector<8x256xf32>
    %82 = arith.maximumf %80, %81 : vector<8x256xf32>
    %cst_20 = arith.constant dense<0.000000e+00> : vector<8x256xf32>
    %83 = tpu.matmul %9, %82, %cst_20 {dimension_numbers = #tpu.dot_dimension_numbers<[1], [0], [0], [1], [0, 0, 1, 1], [], []>} : vector<8x8xf32>, vector<8x256xf32>, vector<8x256xf32> -> vector<8x256xf32>
    %84 = vector.broadcast %10 : vector<8x1xf32> to vector<8x256xf32>
    %85 = arith.addf %83, %84 : vector<8x256xf32>
    %cst_21 = arith.constant 0.000000e+00 : f32
    %86 = vector.broadcast %cst_21 : f32 to vector<8x256xf32>
    %87 = arith.maximumf %85, %86 : vector<8x256xf32>
    %88 = arith.addf %63, %87 : vector<8x256xf32>
    %c0_22 = arith.constant 0 : index
    %c0_23 = arith.constant 0 : index
    %89 = vector.load %arg1[%c0_22, %c0_23] : memref<8x256xf32, #tpu.memory_space<vmem>>, vector<8x256xf32>
    %90 = arith.mulf %88, %89 : vector<8x256xf32>
    %91 = vector.shape_cast %90 : vector<8x256xf32> to vector<8x2x128xf32>
    %92 = arith.truncf %91 : vector<8x2x128xf32> to vector<8x2x128xbf16>
    %c0_24 = arith.constant 0 : index
    %c0_25 = arith.constant 0 : index
    %c0_26 = arith.constant 0 : index
    %93 = vector.load %arg3[%c0_24, %c0_25, %c0_26] : memref<8x128x32xbf16, #tpu.memory_space<vmem>>, vector<8x128x32xbf16>
    "tpu.trace_start"() <{level = 10 : i32, message = "cbn,cnf->cbf"}> : () -> ()
    %cst_27 = arith.constant dense<0.000000e+00> : vector<8x2x32xf32>
    %94 = tpu.matmul %92, %93, %cst_27 {dimension_numbers = #tpu.dot_dimension_numbers<[2], [1], [1], [2], [0, 0, 0, 1, 1, 2], [0], [0]>} : vector<8x2x128xbf16>, vector<8x128x32xbf16>, vector<8x2x32xf32> -> vector<8x2x32xf32>
    "tpu.trace_stop"() : () -> ()
    %cst_28 = arith.constant dense<0.000000e+00> : vector<2x32xf32>
    %95 = vector.multi_reduction <add>, %94, %cst_28 [0] : vector<8x2x32xf32> to vector<2x32xf32>
    %96 = arith.addf %95, %11 : vector<2x32xf32>
    %cst_29 = arith.constant 0.000000e+00 : f32
    %97 = vector.broadcast %cst_29 : f32 to vector<2x32xf32>
    %98 = arith.maximumf %96, %97 : vector<2x32xf32>
    %99 = arith.truncf %98 : vector<2x32xf32> to vector<2x32xbf16>
    %c0_30 = arith.constant 0 : index
    %c0_31 = arith.constant 0 : index
    %100 = vector.load %arg4[%c0_30, %c0_31] : memref<32x128xbf16, #tpu.memory_space<vmem>>, vector<32x128xbf16>
    %cst_32 = arith.constant dense<0.000000e+00> : vector<2x128xf32>
    %101 = tpu.matmul %99, %100, %cst_32 {dimension_numbers = #tpu.dot_dimension_numbers<[1], [0], [0], [1], [0, 0, 1, 1], [], []>} : vector<2x32xbf16>, vector<32x128xbf16>, vector<2x128xf32> -> vector<2x128xf32>
    %102 = arith.addf %101, %12 : vector<2x128xf32>
    %c0_33 = arith.constant 0 : index
    %c0_34 = arith.constant 0 : index
    %103 = vector.load %arg5[%c0_33, %c0_34] : memref<2x128xf32, #tpu.memory_space<vmem>>, vector<2x128xf32>
    tpu.vector_store %arg5[%c0_33, %c0_34], %102 {strides = array<i32>} : memref<2x128xf32, #tpu.memory_space<vmem>>, vector<2x128xf32>,
    return
  }
}

</mosaic_0001>

<bundles_post_ra>
// kernel: stgcn_forward.1
= control target key start
LH: loop header
LB: loop body
LE: loop exit
PB: predicated region body
PF: predicated region fallthrough
CT: control target
= control target key end

     0   :  { %v23_v0 = vlaneseq  ;;  %v1968_v1 = vmov 2   ;;  %v1969_v2 = vmov 0   ;;  %v1970_v8 = vmov 1   ;;  %s1971_s22 = smov 1   ;;  %s1972_s23 = smov 127   ;;  %s2446_s2 = inlined_call_operand.vmem [shape: f32[8,256], index: 2, kind: input, shape index: {}]   ;;  %s2447_s0 = inlined_call_operand.vmem [shape: f32[1,256], index: 0, kind: input, shape index: {}]   ;;  %s2448_s3 = inlined_call_operand.vmem [shape: bf16[8,128,32], index: 3, kind: input, shape index: {}]   ;;  %s2449_s1 = inlined_call_operand.vmem [shape: f32[8,256], index: 1, kind: input, shape index: {}]   ;;  %s2450_s4 = inlined_call_operand.vmem [shape: bf16[32,128], index: 4, kind: input, shape index: {}]   ;;  %s2451_s5 = inlined_call_operand.vmem [shape: f32[2,128], index: 5, kind: output, shape index: {}]  }
   0x1   :  { %1896 = vset.pattern.permute.xlu1 %v1968_v1  ;;  %1894 = vset.pattern.permute.xlu0 %v1969_v2  ;;  %v2020_v3 = vld [vmem:[%s2446_s2] sm:$0xff]  ;;  %v1973_v11 = vmov 3   ;;  %v1975_v12 = vmov 0.0   ;;  %v1976_v13 = vmov 12   ;;  %vm137_vm6 = vcmask 64512   ;;  %s1977_s24 = smov 104  }
   0x2   :  { %108 = vperm.xlu1 %1896, %v2020_v3   ;;  %77 = vperm.xlu0 %1894, %v2020_v3   ;;  %v2024_v4 = vshrl.u32 %v23_v0, 7  ;;  %v54_v5 = vld [vmem:[%s2447_s0] sm:$0x3]  ;;  %s1974_s0 = smov 124   ;;  %v2041_v14 = vand.u32 127, %v23_v0  ;;  %v1978_v60 = vmov 40  }
   0x3   :  { %204 = vmatprep.mubr.f32.mxu0 %v1975_v12  ;;  %293 = vmatprep.mubr.f32.mxu1 %v1975_v12  ;;  %s1979_s25 = smov 112   ;;  %s1980_s26 = smov 96   ;;  %vm1983_vm11 = vmmov 0   ;;  %vm1465_vm12 = vcmask 254976   ;;  %vm1503_vm13 = vcmask 261120  }
   0x4   :  { %v58_v6 = vsub.s32 0, %v2024_v4  ;;  %v62_v7 = vsub.s32 1, %v2024_v4  ;;  %v25_v15 = vadd.s32 128, %v2041_v14  ;;  %v30_v18 = vand.u32 7, %v2041_v14  ;;  %s1981_s27 = smov 80   ;;  %s1984_s9 = smov 64  }
   0x5   :  { %vm70_vm0 = vcmp.lt.s32.totalorder %v2041_v14, 1  ;;  %vm102_vm3 = vcmp.lt.s32.totalorder %v2041_v14, 127  ;;  %v1902_v14 = vld [vmem:[%s2448_s3 + $0x38] sm:$0xff]  }
   0x6   :  { %1895 = vset.pattern.permute.xlu0 %v1970_v8  ;;  %v59_v9 = vrot.slane %v54_v5, %v58_v6  ;;  %v63_v10 = vrot.slane %v54_v5, %v62_v7  ;;  %1898 = vset.pattern.permute.xlu1 %v1976_v13  ;;  %v37_v19 = vand.u32 7, %v25_v15  ;;  %vm2046_vm1 = vcmp.eq.s32.totalorder %v30_v18, 0 }
   0x7   :  { %91 = vperm.xlu0 %1895, %v2020_v3   ;;  %vm2063_vm4 = vcmp.eq.s32.totalorder %v30_v18, 7  ;;  %vm1556_vm7 = vmneg %vm2046_vm1  ;;  %v1906_v18 = vld [vmem:[%s2448_s3 + $0x28] sm:$0xff]  }
   0x8   :  { %66 = vrot.lane.b32.xlu1 %v59_v9, %s1971_s22  ;;  %vm2050_vm2 = vcmp.eq.s32.totalorder %v37_v19, 0  ;;  %vm2067_vm5 = vcmp.eq.s32.totalorder %v37_v19, 7  ;;  %vm1561_vm10 = vmneg %vm2063_vm4  ;;  %v1908_v19 = vld [vmem:[%s2448_s3 + $0x20] sm:$0xff]  }
   0x9   :  { %vm1554_vm8 = vmneg %vm2050_vm2 }
   0xa   :  { %vm1559_vm9 = vmneg %vm2067_vm5 }
   0xb   :  { %98 = vrot.lane.b32.xlu0 %v59_v9, %s1972_s23 }
   0xc   :  { %68 = vrot.lane.b32.xlu1 %v63_v10, %s1971_s22  ;;  %1897 = vset.pattern.permute.xlu0 %v1973_v11 }
   0xf   :  { %124 = vperm.xlu0 %1897, %v2020_v3  }
  0x10   :  { %100 = vrot.lane.b32.xlu1 %v63_v10, %s1972_s23 }
  0x13   :  { %225 = vrot.lane.b32.xlu0 %v2020_v3, %s1977_s24 }
  0x14   :  { %135 = vrot.lane.b32.xlu1 %v2020_v3, %s1974_s0 }
  0x18   :  { %132 = vperm.xlu1 %1898, %v2020_v3  }
  0x1c   :  { %1899 = vset.pattern.permute.xlu1 %v1978_v60 }
  0x7d   :  { %v109_v16 = vpop.permute.xlu1 %108  ;;  %v78_v17 = vpop.permute.xlu0 %77 }
  0x81   :  { %v67_v20 = vpop.permute.xlu1 %66 }
  0x82   :  { %v92_v21 = vpop.permute.xlu0 %91 }
  0x83   :  { %v94_v41 = vmul.f32 %v92_v21, %v59_v9  ;;  %v95_v42 = vmul.f32 %v92_v21, %v63_v10 }
  0x85   :  { %v69_v24 = vpop.permute.xlu1 %68 }
  0x86   :  { %v71_v25 = vsel %vm70_vm0, %v67_v20, %v69_v24  ;;  %v72_v26 = vsel %vm70_vm0, %v69_v24, %v67_v20  ;;  %v99_v33 = vpop.permute.xlu0 %98 }
  0x87   :  { %v73_v27 = vsel %vm2046_vm1, 0.0, %v72_v26  ;;  %v74_v28 = vsel %vm2050_vm2, 0.0, %v71_v25 }
  0x88   :  { %v83_v29 = vrot.slane %v73_v27, %v58_v6  ;;  %v87_v30 = vrot.slane %v74_v28, %v58_v6 }
  0x89   :  { %v101_v34 = vpop.permute.xlu1 %100 }
  0x8a   :  { %v88_v35 = vmul.f32 %v83_v29, %v78_v17  ;;  %v89_v36 = vmul.f32 %v87_v30, %v78_v17  ;;  %v103_v37 = vsel %vm102_vm3, %v99_v33, %v101_v34  ;;  %v104_v38 = vsel %vm102_vm3, %v101_v34, %v99_v33  ;;  %v125_v49 = vpop.permute.xlu0 %124  ;;  %v1904_v17 = vld [vmem:[%s2448_s3 + $0x30] sm:$0xff]  }
  0x8b   :  { %v105_v39 = vsel %vm2063_vm4, 0.0, %v103_v37  ;;  %v106_v40 = vsel %vm2067_vm5, 0.0, %v104_v38  ;;  %v1905_v37 = vld [vmem:[%s2448_s3 + $0x70] sm:$0xff]   ;;  %v1907_v38 = vld [vmem:[%s2448_s3 + $0x68] sm:$0xff]  }
  0x8c   :  { %v114_v43 = vrot.slane %v105_v39, %v58_v6  ;;  %v118_v44 = vrot.slane %v106_v40, %v58_v6  ;;  %v96_v45 = vadd.f32 %v94_v41, %v88_v35  ;;  %v97_v47 = vadd.f32 %v95_v42, %v89_v36  ;;  %v1903_v36 = vld [vmem:[%s2448_s3 + $0x78] sm:$0xff]   ;;  %v1909_v39 = vld [vmem:[%s2448_s3 + $0x60] sm:$0xff]   ;;  %v1912_v42 = vld [vmem:[%s2448_s3 + $0x10] sm:$0xff]  }
  0x8d   :  { %v136_v56 = vpop.permute.xlu1 %135  ;;  %v1910_v40 = vld [vmem:[%s2448_s3 + $0x18] sm:$0xff]  }
  0x8e   :  { %v119_v46 = vmul.f32 %v114_v43, %v109_v16  ;;  %v120_v48 = vmul.f32 %v118_v44, %v109_v16  ;;  %v226_v1 = vpop.permute.xlu0 %225  ;;  %v1982_v16 = vmov 56   ;;  %v1911_v41 = vld [vmem:[%s2448_s3 + $0x58] sm:$0xff]   ;;  %v1913_v43 = vld [vmem:[%s2448_s3 + $0x50] sm:$0xff]   ;;  %v1914_v44 = vld [vmem:[%s2448_s3 + $0x8] sm:$0xff]  }
  0x8f   :  { %1901 = vset.pattern.permute.xlu0 %v1982_v16 }
  0x90   :  { %v121_v50 = vadd.f32 %v119_v46, %v96_v45  ;;  %v122_v51 = vadd.f32 %v120_v48, %v97_v47  ;;  %v1915_v45 = vld [vmem:[%s2448_s3 + $0x48] sm:$0xff]   ;;  %v1916_v46 = vld [vmem:[%s2448_s3] sm:$0xff]  }
  0x91   :  { %v1917_v47 = vld [vmem:[%s2448_s3 + $0x40] sm:$0xff]  }
  0x92   :  { %v127_v52 = vadd.f32 %v125_v49, %v121_v50  ;;  %v128_v53 = vadd.f32 %v125_v49, %v122_v51  ;;  %v1985_v49 = vmov 1983009808  }
  0x93   :  { %v133_v57 = vpop.permute.xlu1 %132  ;;  %v561_v50 = vunpack.c.l.s4 %v1985_v49  ;;  %v1941_v49 = vld [vmem:[%s2448_s3 + $0x160] sm:$0xff]  }
  0x94   :  { %v130_v54 = vmax.f32 %v128_v53, 0.0  ;;  %v129_v55 = vmax.f32 %v127_v52, 0.0 }
  0x96   :  { %170 = vmatprep.subr.mxu0 %v130_v54 }
  0x97   :  { %171 = vmatpush1.msra.mxu0 %v129_v55  ;;  %v562_v55 = vunpack.c.0.s8 %v561_v50  ;;  %v1942_v50 = vld [vmem:[%s2448_s3 + $0x118] sm:$0xff]  }
  0x98   :  { %1552 = vmatmul.mubr.msk.f32.vlgmr.msra.gmra.mxu0 %vm137_vm6, %v136_v56 }
  0x99   :  { %368 = vmatprep.mubr.f32.mxu0 %v1975_v12 }
 0x158   :  { %v206_v58 = vpop.f32.mrf.mxu0 }
 0x159   :  { %v207_v59 = vadd.f32 %v206_v58, %v133_v57 }
 0x15a   :  { %v208_v61 = vpop.f32.mrf.mxu0 }
 0x15b   :  { %v2082_v62 = vmax.f32 %v207_v59, 0.0  ;;  %v209_v63 = vadd.f32 %v208_v61, %v133_v57  ;;  %v1986_v57 = vmov 1934713408   ;;  %v555_v59 = vld [vmem:[%s2449_s1] sm:$0xff] }
 0x15c   :  { %v592_v58 = vunpack.c.l.s4 %v1986_v57  ;;  %v1949_v57 = vld [vmem:[%s2448_s3 + $0x140] sm:$0xff]  }
 0x15d   :  { %v2084_v0 = vmax.f32 %v209_v63, 0.0  ;;  %375 = vrot.lane.b32.xlu1 %v2082_v62, %s1972_s23  ;;  %213 = vrot.lane.b32.xlu0 %v2082_v62, %s1971_s22 }
 0x15f   :  { %259 = vmatprep.subr.mxu1 %v2084_v0 }
 0x160   :  { %260 = vmatpush1.msra.mxu1 %v2082_v62 }
 0x161   :  { %215 = vrot.lane.b32.xlu1 %v2084_v0, %s1971_s22  ;;  %377 = vrot.lane.b32.xlu0 %v2084_v0, %s1972_s23 }
 0x162   :  { %1553 = vmatmul.mubr.msk.f32.vlgmr.msra.gmra.mxu1 %vm137_vm6, %v226_v1  ;;  %v565_v1 = vsub.s32 %v562_v55, %v2024_v4  ;;  %v1947_v55 = vld [vmem:[%s2448_s3 + $0x148] sm:$0xff]  }
 0x163   :  { %455 = vmatprep.mubr.f32.mxu1 %v1975_v12 }
 0x165   :  { %300 = vrot.lane.b32.xlu1 %v2020_v3, %s1979_s25  ;;  %387 = vrot.lane.b32.xlu0 %v2020_v3, %s1980_s26 }
 0x169   :  { %465 = vperm.xlu1 %1899, %v2020_v3   ;;  %476 = vrot.lane.b32.xlu0 %v2020_v3, %s1981_s27 }
 0x16d   :  { %1900 = vset.pattern.permute.xlu1 %v1982_v16  ;;  %1481 = vrot.lane.b32.xlu0 %v2020_v3, %s1984_s9 }
 0x16e   :  { %473 = vperm.xlu1 %1900, %v2020_v3   ;;  %v556_v3 = vld [vmem:[%s2449_s1 + $0x8] sm:$0xff] }
 0x1cf   :  { %v376_v2 = vpop.permute.xlu1 %375  ;;  %v214_v5 = vpop.permute.xlu0 %213 }
 0x1d3   :  { %v216_v6 = vpop.permute.xlu1 %215  ;;  %v378_v7 = vpop.permute.xlu0 %377 }
 0x1d4   :  { %v217_v8 = vsel %vm70_vm0, %v214_v5, %v216_v6  ;;  %v218_v9 = vsel %vm70_vm0, %v216_v6, %v214_v5  ;;  %v379_v10 = vsel %vm102_vm3, %v376_v2, %v378_v7  ;;  %v380_v11 = vsel %vm102_vm3, %v378_v7, %v376_v2 }
 0x1d5   :  { %1555 = vmatprep.subr.msk.mxu0 %vm1554_vm8, %v217_v8  ;;  %1560 = vmatprep.subr.msk.mxu1 %vm1559_vm9, %v380_v11  ;;  %v593_v5 = vunpack.c.0.s8 %v592_v58 }
 0x1d6   :  { %1557 = vmatpush1.msk.msra.mxu0 %vm1556_vm7, %v218_v9  ;;  %1562 = vmatpush1.msk.msra.mxu1 %vm1561_vm10, %v379_v10 }
 0x1d7   :  { %v301_v13 = vpop.permute.xlu1 %300  ;;  %v388_v15 = vpop.permute.xlu0 %387  ;;  %1707 = vmatprep.subr.bf16.mxu1 %v1975_v12 }
 0x1d8   :  { %1558 = vmatmul.mubr.msk.f32.vlgmr.msra.gmra.mxu0 %vm137_vm6, %v301_v13  ;;  %1563 = vmatmul.mubr.msk.f32.vlgmr.msra.gmra.mxu1 %vm137_vm6, %v388_v15 }
 0x1d9   :  { %544 = vmatprep.mubr.f32.mxu0 %v1975_v12  ;;  %1708 = vmatpush3.bf16.msra.mxu1 %v1902_v14 }
 0x1da   :  { %1709 = vmatprep.subr.bf16.mxu1 %v1975_v12  ;;  %1723 = vmatprep.mubr.msk.bf16.mxu1 %vm1983_vm11, %v1975_v12 }
 0x1db   :  { %v477_v35 = vpop.permute.xlu0 %476 }
 0x1dd   :  { %1710 = vmatpush3.bf16.msra.mxu1 %v1904_v17 }
 0x1de   :  { %1711 = vmatprep.subr.bf16.mxu1 %v1975_v12 }
 0x1e1   :  { %1712 = vmatpush3.bf16.msra.mxu1 %v1906_v18 }
 0x1e2   :  { %1713 = vmatprep.subr.bf16.mxu1 %v1975_v12 }
 0x1e4   :  { %v466_v28 = vpop.permute.xlu1 %465 }
 0x1e5   :  { %1714 = vmatpush3.bf16.msra.mxu1 %v1908_v19 }
 0x1e6   :  { %1715 = vmatprep.subr.bf16.mxu1 %v1975_v12 }
 0x1e9   :  { %1716 = vmatpush3.bf16.msra.mxu1 %v1910_v40  ;;  %v474_v48 = vpop.permute.xlu1 %473  ;;  %v1934_v40 = vld [vmem:[%s2448_s3 + $0x138] sm:$0xff]  }
 0x1ea   :  { %1717 = vmatprep.subr.bf16.mxu1 %v1975_v12 }
 0x1ed   :  { %1718 = vmatpush3.bf16.msra.mxu1 %v1912_v42  ;;  %v1935_v42 = vld [vmem:[%s2448_s3 + $0x178] sm:$0xff]  }
 0x1ee   :  { %1719 = vmatprep.subr.bf16.mxu1 %v1975_v12 }
 0x1f1   :  { %1720 = vmatpush3.bf16.msra.mxu1 %v1914_v44  ;;  %v1936_v44 = vld [vmem:[%s2448_s3 + $0x130] sm:$0xff]  }
 0x1f2   :  { %1721 = vmatprep.subr.bf16.mxu1 %v1975_v12 }
 0x1f5   :  { %1722 = vmatpush3.bf16.msra.mxu1 %v1916_v46  ;;  %v1938_v46 = vld [vmem:[%s2448_s3 + $0x128] sm:$0xff]  }
 0x1f6   :  { %1747 = vmatprep.subr.bf16.mxu1 %v1975_v12 }
 0x222   :  { %v295_v20 = vpop.f32.mrf.mxu1 }
 0x224   :  { %v297_v21 = vpop.f32.mrf.mxu1 }
 0x298   :  { %v370_v22 = vpop.f32.mrf.mxu0  ;;  %v457_v23 = vpop.f32.mrf.mxu1 }
 0x299   :  { %v371_v24 = vadd.f32 %v370_v22, %v295_v20  ;;  %v1919_v20 = vld [vmem:[%s2448_s3 + $0xf8] sm:$0xff]  }
 0x29a   :  { %v372_v25 = vpop.f32.mrf.mxu0  ;;  %v459_v29 = vpop.f32.mrf.mxu1 }
 0x29b   :  { %v462_v26 = vadd.f32 %v457_v23, %v371_v24  ;;  %v373_v27 = vadd.f32 %v372_v25, %v297_v21  ;;  %v1920_v23 = vld [vmem:[%s2448_s3 + $0xb0] sm:$0xff]   ;;  %v1922_v25 = vld [vmem:[%s2448_s3 + $0xa8] sm:$0xff]  }
 0x29c   :  { %v1921_v24 = vld [vmem:[%s2448_s3 + $0xf0] sm:$0xff]  }
 0x29d   :  { %v463_v30 = vadd.f32 %v459_v29, %v373_v27  ;;  %v468_v31 = vadd.f32 %v466_v28, %v462_v26  ;;  %v1923_v26 = vld [vmem:[%s2448_s3 + $0xe8] sm:$0xff]   ;;  %v1924_v27 = vld [vmem:[%s2448_s3 + $0xa0] sm:$0xff]   ;;  %v1926_v29 = vld [vmem:[%s2448_s3 + $0x98] sm:$0xff]  }
 0x29f   :  { %v469_v32 = vadd.f32 %v466_v28, %v463_v30  ;;  %v470_v34 = vmax.f32 %v468_v31, 0.0  ;;  %v1925_v28 = vld [vmem:[%s2448_s3 + $0xe0] sm:$0xff]   ;;  %v1927_v30 = vld [vmem:[%s2448_s3 + $0xd8] sm:$0xff]   ;;  %v1928_v31 = vld [vmem:[%s2448_s3 + $0x90] sm:$0xff]  }
 0x2a1   :  { %v471_v33 = vmax.f32 %v469_v32, 0.0  ;;  %v1929_v32 = vld [vmem:[%s2448_s3 + $0xd0] sm:$0xff]  }
 0x2a3   :  { %510 = vmatprep.subr.mxu0 %v471_v33 }
 0x2a4   :  { %511 = vmatpush1.msra.mxu0 %v470_v34  ;;  %v1930_v34 = vld [vmem:[%s2448_s3 + $0x88] sm:$0xff]  }
 0x2a5   :  { %1564 = vmatmul.mubr.msk.f32.vlgmr.msra.gmra.mxu0 %vm137_vm6, %v477_v35  ;;  %1727 = vmatprep.subr.bf16.mxu0 %v1975_v12  ;;  %v1931_v35 = vld [vmem:[%s2448_s3 + $0xc8] sm:$0xff]  }
 0x2a6   :  { %1728 = vmatpush3.bf16.msra.mxu0 %v1903_v36  ;;  %1743 = vmatprep.mubr.msk.bf16.mxu0 %vm1983_vm11, %v1975_v12 }
 0x2a7   :  { %1729 = vmatprep.subr.bf16.mxu0 %v1975_v12 }
 0x2aa   :  { %1730 = vmatpush3.bf16.msra.mxu0 %v1905_v37  ;;  %v1932_v37 = vld [vmem:[%s2448_s3 + $0x80] sm:$0xff]  }
 0x2ab   :  { %1731 = vmatprep.subr.bf16.mxu0 %v1975_v12 }
 0x2ae   :  { %1732 = vmatpush3.bf16.msra.mxu0 %v1907_v38  ;;  %v1933_v38 = vld [vmem:[%s2448_s3 + $0xc0] sm:$0xff]  }
 0x2af   :  { %1733 = vmatprep.subr.bf16.mxu0 %v1975_v12 }
 0x2b2   :  { %1734 = vmatpush3.bf16.msra.mxu0 %v1909_v39 }
 0x2b3   :  { %1735 = vmatprep.subr.bf16.mxu0 %v1975_v12 }
 0x2b6   :  { %1736 = vmatpush3.bf16.msra.mxu0 %v1911_v41 }
 0x2b7   :  { %1737 = vmatprep.subr.bf16.mxu0 %v1975_v12 }
 0x2ba   :  { %1738 = vmatpush3.bf16.msra.mxu0 %v1913_v43 }
 0x2bb   :  { %1739 = vmatprep.subr.bf16.mxu0 %v1975_v12 }
 0x2be   :  { %1740 = vmatpush3.bf16.msra.mxu0 %v1915_v45  ;;  %v1937_v45 = vld [vmem:[%s2448_s3 + $0x170] sm:$0xff]  }
 0x2bf   :  { %1741 = vmatprep.subr.bf16.mxu0 %v1975_v12 }
 0x2c2   :  { %1742 = vmatpush3.bf16.msra.mxu0 %v1917_v47  ;;  %v1939_v47 = vld [vmem:[%s2448_s3 + $0x168] sm:$0xff]  }
 0x2c3   :  { %1767 = vmatprep.subr.bf16.mxu0 %v1975_v12 }
 0x365   :  { %v546_v51 = vpop.f32.mrf.mxu0 }
 0x366   :  { %v547_v52 = vadd.f32 %v546_v51, %v474_v48  ;;  %v1943_v51 = vld [vmem:[%s2448_s3 + $0x158] sm:$0xff]  }
 0x367   :  { %v548_v53 = vpop.f32.mrf.mxu0 }
 0x368   :  { %v551_v54 = vmax.f32 %v547_v52, 0.0  ;;  %v549_v56 = vadd.f32 %v548_v53, %v474_v48  ;;  %v1940_v48 = vld [vmem:[%s2448_s3 + $0x120] sm:$0xff]   ;;  %v1944_v52 = vld [vmem:[%s2448_s3 + $0x110] sm:$0xff]  }
 0x369   :  { %v1945_v53 = vld [vmem:[%s2448_s3 + $0x150] sm:$0xff]  }
 0x36a   :  { %v553_v60 = vadd.f32 %v551_v54, %v2082_v62  ;;  %v552_v61 = vmax.f32 %v549_v56, 0.0  ;;  %v596_v62 = vsub.s32 %v593_v5, %v2024_v4  ;;  %v1946_v54 = vld [vmem:[%s2448_s3 + $0x108] sm:$0xff]   ;;  %v1948_v56 = vld [vmem:[%s2448_s3 + $0x100] sm:$0xff]  }
 0x36b   :  { %v1955_v5 = vld [vmem:[%s2448_s3 + $0x1e8] sm:$0xff]  }
 0x36c   :  { %v557_v63 = vmul.f32 %v555_v59, %v553_v60  ;;  %v554_v2 = vadd.f32 %v552_v61, %v2084_v0  ;;  %v1918_v0 = vld [vmem:[%s2448_s3 + $0xb8] sm:$0xff]  }
 0x36d   :  { %v1950_v59 = vld [vmem:[%s2448_s3 + $0x1b8] sm:$0xff]  }
 0x36e   :  { %v559_v6 = vcombine.high %v557_v63, %v1975_v12  ;;  %v558_v7 = vmul.f32 %v556_v3, %v554_v2  ;;  %v566_v8 = vrot.slane %v557_v63, %v565_v1  ;;  %v1951_v61 = vld [vmem:[%s2448_s3 + $0x1f8] sm:$0xff]   ;;  %v1952_v63 = vld [vmem:[%s2448_s3 + $0x1b0] sm:$0xff]   ;;  %v1954_v2 = vld [vmem:[%s2448_s3 + $0x1a8] sm:$0xff]  }
 0x370   :  { %v574_v9 = vcombine.high %v558_v7, %v1975_v12  ;;  %v581_v10 = vrot.slane %v558_v7, %v565_v1  ;;  %v573_v11 = vrot.slane %v559_v6, %v565_v1  ;;  %v1956_v6 = vld [vmem:[%s2448_s3 + $0x1a0] sm:$0xff]  }
 0x371   :  { %v1957_v7 = vld [vmem:[%s2448_s3 + $0x1e0] sm:$0xff]  }
 0x372   :  { %v588_v13 = vrot.slane %v574_v9, %v565_v1  ;;  %v589_v15 = vcombine.low %v566_v8, %v581_v10  ;;  %v590_v33 = vcombine.high %v566_v8, %v581_v10  ;;  %v1953_v1 = vld [vmem:[%s2448_s3 + $0x1f0] sm:$0xff]   ;;  %v1958_v8 = vld [vmem:[%s2448_s3 + $0x198] sm:$0xff]  }
 0x373   :  { %v1959_v9 = vld [vmem:[%s2448_s3 + $0x1d8] sm:$0xff]   ;;  %v1960_v10 = vld [vmem:[%s2448_s3 + $0x190] sm:$0xff]  }
 0x374   :  { %v605_v16 = vcombine.low %v573_v11, %v588_v13  ;;  %v606_v14 = vcombine.high %v573_v11, %v588_v13  ;;  %v597_v17 = vrot.slane %v589_v15, %v596_v62  ;;  %v604_v36 = vrot.slane %v590_v33, %v596_v62  ;;  %v1962_v11 = vld [vmem:[%s2448_s3 + $0x188] sm:$0xff]   ;;  %v1964_v15 = vld [vmem:[%s2448_s3 + $0x180] sm:$0xff]  }
 0x375   :  { %v1963_v13 = vld [vmem:[%s2448_s3 + $0x1c8] sm:$0xff]  }
 0x376   :  { %v625_v18 = vpack.c.bf16 %v597_v17, %v597_v17  ;;  %v621_v19 = vcombine.high %v597_v17, %v1975_v12  ;;  %v2213_v21 = vrot.slane %v605_v16, %v596_v62  ;;  %v2215_v4 = vrot.slane %v606_v14, %v596_v62  ;;  %v1961_v62 = vld [vmem:[%s2448_s3 + $0x1d0] sm:$0xff]   ;;  %v1965_v16 = vld [vmem:[%s2448_s3 + $0x1c0] sm:$0xff]  }
 0x377   :  { %v622_v39 = vcombine.high %v604_v36, %v1975_v12  ;;  %v627_v41 = vpack.c.bf16 %v604_v36, %v604_v36 }
 0x378   :  { %1724 = vmatmul.mubr.bf16.vlgmr.msra.gmra.mxu1 %v625_v18  ;;  %v626_v22 = vpack.c.bf16 %v621_v19, %v621_v19  ;;  %v623_v58 = vcombine.high %v2213_v21, %v1975_v12  ;;  %v629_v60 = vpack.c.bf16 %v2213_v21, %v2213_v21  ;;  %v624_v14 = vcombine.high %v2215_v4, %v1975_v12  ;;  %v1966_v18 = vld [vmem:[%s2450_s4 + $0x8] sm:$0xff]   ;;  %v1967_v19 = vld [vmem:[%s2450_s4] sm:$0xff]  }
 0x379   :  { %1748 = vmatpush3.bf16.msra.mxu1 %v1918_v0  ;;  %1763 = vmatprep.mubr.msk.bf16.mxu1 %vm1983_vm11, %v1975_v12  ;;  %v628_v43 = vpack.c.bf16 %v622_v39, %v622_v39  ;;  %v631_v17 = vpack.c.bf16 %v2215_v4, %v2215_v4 }
 0x37a   :  { %1744 = vmatmul.mubr.bf16.vlgmr.msra.gmra.mxu0 %v626_v22  ;;  %1749 = vmatprep.subr.bf16.mxu1 %v1975_v12  ;;  %v630_v3 = vpack.c.bf16 %v623_v58, %v623_v58  ;;  %v632_v0 = vpack.c.bf16 %v624_v14, %v624_v14 }
 0x37b   :  { %1768 = vmatpush3.bf16.msra.mxu0 %v1919_v20  ;;  %1783 = vmatprep.mubr.msk.bf16.mxu0 %vm1983_vm11, %v1975_v12 }
 0x37c   :  { %1769 = vmatprep.subr.bf16.mxu0 %v1975_v12 }
 0x37d   :  { %1750 = vmatpush3.bf16.msra.mxu1 %v1920_v23 }
 0x37e   :  { %1751 = vmatprep.subr.bf16.mxu1 %v1975_v12 }
 0x37f   :  { %1770 = vmatpush3.bf16.msra.mxu0 %v1921_v24 }
 0x380   :  { %1771 = vmatprep.subr.bf16.mxu0 %v1975_v12 }
 0x381   :  { %1752 = vmatpush3.bf16.msra.mxu1 %v1922_v25 }
 0x382   :  { %1753 = vmatprep.subr.bf16.mxu1 %v1975_v12 }
 0x383   :  { %1772 = vmatpush3.bf16.msra.mxu0 %v1923_v26 }
 0x384   :  { %1773 = vmatprep.subr.bf16.mxu0 %v1975_v12 }
 0x385   :  { %1754 = vmatpush3.bf16.msra.mxu1 %v1924_v27 }
 0x386   :  { %1755 = vmatprep.subr.bf16.mxu1 %v1975_v12 }
 0x387   :  { %1774 = vmatpush3.bf16.msra.mxu0 %v1925_v28 }
 0x388   :  { %1775 = vmatprep.subr.bf16.mxu0 %v1975_v12 }
 0x389   :  { %1756 = vmatpush3.bf16.msra.mxu1 %v1926_v29 }
 0x38a   :  { %1757 = vmatprep.subr.bf16.mxu1 %v1975_v12 }
 0x38b   :  { %1776 = vmatpush3.bf16.msra.mxu0 %v1927_v30 }
 0x38c   :  { %1777 = vmatprep.subr.bf16.mxu0 %v1975_v12 }
 0x38d   :  { %1758 = vmatpush3.bf16.msra.mxu1 %v1928_v31 }
 0x38e   :  { %1759 = vmatprep.subr.bf16.mxu1 %v1975_v12 }
 0x38f   :  { %1778 = vmatpush3.bf16.msra.mxu0 %v1929_v32 }
 0x390   :  { %1779 = vmatprep.subr.bf16.mxu0 %v1975_v12 }
 0x391   :  { %1760 = vmatpush3.bf16.msra.mxu1 %v1930_v34 }
 0x392   :  { %1761 = vmatprep.subr.bf16.mxu1 %v1975_v12 }
 0x393   :  { %1780 = vmatpush3.bf16.msra.mxu0 %v1931_v35 }
 0x394   :  { %1781 = vmatprep.subr.bf16.mxu0 %v1975_v12 }
 0x395   :  { %1762 = vmatpush3.bf16.msra.mxu1 %v1932_v37 }
 0x396   :  { %1787 = vmatprep.subr.bf16.mxu1 %v1975_v12 }
 0x397   :  { %1782 = vmatpush3.bf16.msra.mxu0 %v1933_v38 }
 0x398   :  { %1764 = vmatmul.mubr.bf16.vlgmr.msra.gmra.mxu1 %v627_v41  ;;  %1807 = vmatprep.subr.bf16.mxu0 %v1975_v12 }
 0x399   :  { %1788 = vmatpush3.bf16.msra.mxu1 %v1934_v40  ;;  %1803 = vmatprep.mubr.msk.bf16.mxu1 %vm1983_vm11, %v1975_v12 }
 0x39a   :  { %1784 = vmatmul.mubr.bf16.vlgmr.msra.gmra.mxu0 %v628_v43  ;;  %1789 = vmatprep.subr.bf16.mxu1 %v1975_v12 }
 0x39b   :  { %1808 = vmatpush3.bf16.msra.mxu0 %v1935_v42  ;;  %1823 = vmatprep.mubr.msk.bf16.mxu0 %vm1983_vm11, %v1975_v12 }
 0x39c   :  { %1809 = vmatprep.subr.bf16.mxu0 %v1975_v12 }
 0x39d   :  { %1790 = vmatpush3.bf16.msra.mxu1 %v1936_v44 }
 0x39e   :  { %1791 = vmatprep.subr.bf16.mxu1 %v1975_v12 }
 0x39f   :  { %1810 = vmatpush3.bf16.msra.mxu0 %v1937_v45 }
 0x3a0   :  { %1811 = vmatprep.subr.bf16.mxu0 %v1975_v12 }
 0x3a1   :  { %1792 = vmatpush3.bf16.msra.mxu1 %v1938_v46 }
 0x3a2   :  { %1793 = vmatprep.subr.bf16.mxu1 %v1975_v12 }
 0x3a3   :  { %1812 = vmatpush3.bf16.msra.mxu0 %v1939_v47 }
 0x3a4   :  { %1813 = vmatprep.subr.bf16.mxu0 %v1975_v12 }
 0x3a5   :  { %1794 = vmatpush3.bf16.msra.mxu1 %v1940_v48 }
 0x3a6   :  { %1795 = vmatprep.subr.bf16.mxu1 %v1975_v12 }
 0x3a7   :  { %1814 = vmatpush3.bf16.msra.mxu0 %v1941_v49 }
 0x3a8   :  { %1815 = vmatprep.subr.bf16.mxu0 %v1975_v12 }
 0x3a9   :  { %1796 = vmatpush3.bf16.msra.mxu1 %v1942_v50 }
 0x3aa   :  { %1797 = vmatprep.subr.bf16.mxu1 %v1975_v12 }
 0x3ab   :  { %1816 = vmatpush3.bf16.msra.mxu0 %v1943_v51 }
 0x3ac   :  { %1817 = vmatprep.subr.bf16.mxu0 %v1975_v12 }
 0x3ad   :  { %1798 = vmatpush3.bf16.msra.mxu1 %v1944_v52 }
 0x3ae   :  { %1799 = vmatprep.subr.bf16.mxu1 %v1975_v12 }
 0x3af   :  { %1818 = vmatpush3.bf16.msra.mxu0 %v1945_v53 }
 0x3b0   :  { %1819 = vmatprep.subr.bf16.mxu0 %v1975_v12 }
 0x3b1   :  { %1800 = vmatpush3.bf16.msra.mxu1 %v1946_v54 }
 0x3b2   :  { %1801 = vmatprep.subr.bf16.mxu1 %v1975_v12 }
 0x3b3   :  { %1820 = vmatpush3.bf16.msra.mxu0 %v1947_v55 }
 0x3b4   :  { %1821 = vmatprep.subr.bf16.mxu0 %v1975_v12 }
 0x3b5   :  { %1802 = vmatpush3.bf16.msra.mxu1 %v1948_v56 }
 0x3b6   :  { %1827 = vmatprep.subr.bf16.mxu1 %v1975_v12 }
 0x3b7   :  { %1822 = vmatpush3.bf16.msra.mxu0 %v1949_v57 }
 0x3b8   :  { %1804 = vmatmul.mubr.bf16.vlgmr.msra.gmra.mxu1 %v629_v60  ;;  %1847 = vmatprep.subr.bf16.mxu0 %v1975_v12 }
 0x3b9   :  { %1828 = vmatpush3.bf16.msra.mxu1 %v1950_v59  ;;  %1843 = vmatprep.mubr.msk.bf16.mxu1 %vm1983_vm11, %v1975_v12  ;;  %v1482_v59 = vpop.permute.xlu0 %1481 }
 0x3ba   :  { %1824 = vmatmul.mubr.bf16.vlgmr.msra.gmra.mxu0 %v630_v3  ;;  %1829 = vmatprep.subr.bf16.mxu1 %v1975_v12 }
 0x3bb   :  { %1848 = vmatpush3.bf16.msra.mxu0 %v1951_v61  ;;  %1863 = vmatprep.mubr.msk.bf16.mxu0 %vm1983_vm11, %v1975_v12 }
 0x3bc   :  { %1849 = vmatprep.subr.bf16.mxu0 %v1975_v12 }
 0x3bd   :  { %1830 = vmatpush3.bf16.msra.mxu1 %v1952_v63 }
 0x3be   :  { %1831 = vmatprep.subr.bf16.mxu1 %v1975_v12 }
 0x3bf   :  { %1850 = vmatpush3.bf16.msra.mxu0 %v1953_v1 }
 0x3c0   :  { %1851 = vmatprep.subr.bf16.mxu0 %v1975_v12 }
 0x3c1   :  { %1832 = vmatpush3.bf16.msra.mxu1 %v1954_v2 }
 0x3c2   :  { %1833 = vmatprep.subr.bf16.mxu1 %v1975_v12 }
 0x3c3   :  { %1852 = vmatpush3.bf16.msra.mxu0 %v1955_v5 }
 0x3c4   :  { %1853 = vmatprep.subr.bf16.mxu0 %v1975_v12 }
 0x3c5   :  { %1834 = vmatpush3.bf16.msra.mxu1 %v1956_v6 }
 0x3c6   :  { %1835 = vmatprep.subr.bf16.mxu1 %v1975_v12 }
 0x3c7   :  { %1854 = vmatpush3.bf16.msra.mxu0 %v1957_v7 }
 0x3c8   :  { %1855 = vmatprep.subr.bf16.mxu0 %v1975_v12 }
 0x3c9   :  { %1836 = vmatpush3.bf16.msra.mxu1 %v1958_v8  ;;  %v22_v8 = vld [vmem:[%s2446_s2 + $0x8] sm:$0xff] }
 0x3ca   :  { %1837 = vmatprep.subr.bf16.mxu1 %v1975_v12 }
 0x3cb   :  { %1856 = vmatpush3.bf16.msra.mxu0 %v1959_v9 }
 0x3cc   :  { %1857 = vmatprep.subr.bf16.mxu0 %v1975_v12 }
 0x3cd   :  { %1838 = vmatpush3.bf16.msra.mxu1 %v1960_v10 }
 0x3ce   :  { %1839 = vmatprep.subr.bf16.mxu1 %v1975_v12 }
 0x3cf   :  { %1858 = vmatpush3.bf16.msra.mxu0 %v1961_v62 }
 0x3d0   :  { %1859 = vmatprep.subr.bf16.mxu0 %v1975_v12 }
 0x3d1   :  { %1840 = vmatpush3.bf16.msra.mxu1 %v1962_v11 }
 0x3d2   :  { %1841 = vmatprep.subr.bf16.mxu1 %v1975_v12 }
 0x3d3   :  { %1860 = vmatpush3.bf16.msra.mxu0 %v1963_v13 }
 0x3d4   :  { %1861 = vmatprep.subr.bf16.mxu0 %v1975_v12 }
 0x3d5   :  { %1842 = vmatpush3.bf16.msra.mxu1 %v1964_v15 }
 0x3d6   :  { %1867 = vmatprep.subr.bf16.mxu1 %v1975_v12 }
 0x3d7   :  { %1862 = vmatpush3.bf16.msra.mxu0 %v1965_v16 }
 0x3d8   :  { %1844 = vmatmul.mubr.bf16.vlgmr.msra.gmra.mxu1 %v631_v17 }
 0x3d9   :  { %1871 = vmatprep.mubr.msk.bf16.mxu1 %vm1983_vm11, %v1975_v12  ;;  %1868 = vmatpush3.bf16.msra.mxu1 %v1966_v18 }
 0x3da   :  { %1864 = vmatmul.mubr.bf16.vlgmr.msra.gmra.mxu0 %v632_v0  ;;  %1869 = vmatprep.subr.bf16.mxu1 %v1975_v12 }
 0x3dd   :  { %1870 = vmatpush3.bf16.msra.mxu1 %v1967_v19 }
 0x438   :  { %v843_v20 = vpop.f32.mrf.mxu1 }
 0x439   :  { %v1466_v22 = vsel %vm1465_vm12, %v843_v20, 0.0 }
 0x43a   :  { %v1725_v21 = vpop.f32.mrf.mxu1  ;;  %v931_v4 = vpop.f32.mrf.mxu0 }
 0x43b   :  { %v1467_v23 = vsel %vm1465_vm12, %v931_v4, 0.0 }
 0x43c   :  { %v1468_v24 = vadd.f32 %v1467_v23, %v1466_v22  ;;  %v846_v25 = vpop.f32.mrf.mxu1  ;;  %v1745_v26 = vpop.f32.mrf.mxu0 }
 0x43e   :  { %v1726_v27 = vpop.f32.mrf.mxu1  ;;  %v934_v28 = vpop.f32.mrf.mxu0 }
 0x440   :  { %v1746_v29 = vpop.f32.mrf.mxu0 }
 0x458   :  { %v1019_v12 = vpop.f32.mrf.mxu1 }
 0x459   :  { %v1469_v45 = vsel %vm1465_vm12, %v1019_v12, 0.0 }
 0x45a   :  { %v1765_v30 = vpop.f32.mrf.mxu1  ;;  %v1107_v31 = vpop.f32.mrf.mxu0  ;;  %v1470_v46 = vadd.f32 %v1469_v45, %v1468_v24 }
 0x45b   :  { %v1471_v47 = vsel %vm1465_vm12, %v1107_v31, 0.0 }
 0x45c   :  { %v1022_v32 = vpop.f32.mrf.mxu1  ;;  %v1785_v33 = vpop.f32.mrf.mxu0  ;;  %v1472_v49 = vadd.f32 %v1471_v47, %v1470_v46 }
 0x45e   :  { %v1766_v34 = vpop.f32.mrf.mxu1  ;;  %v1110_v35 = vpop.f32.mrf.mxu0 }
 0x460   :  { %v1786_v36 = vpop.f32.mrf.mxu0 }
 0x478   :  { %v1195_v37 = vpop.f32.mrf.mxu1 }
 0x479   :  { %v1473_v48 = vsel %vm1465_vm12, %v1195_v37, 0.0 }
 0x47a   :  { %v1805_v38 = vpop.f32.mrf.mxu1  ;;  %v1283_v39 = vpop.f32.mrf.mxu0  ;;  %v1474_v50 = vadd.f32 %v1473_v48, %v1472_v49 }
 0x47b   :  { %v1475_v51 = vsel %vm1465_vm12, %v1283_v39, 0.0 }
 0x47c   :  { %v1198_v40 = vpop.f32.mrf.mxu1  ;;  %v1825_v41 = vpop.f32.mrf.mxu0  ;;  %v1476_v52 = vadd.f32 %v1475_v51, %v1474_v50 }
 0x47e   :  { %v1806_v42 = vpop.f32.mrf.mxu1  ;;  %v1286_v43 = vpop.f32.mrf.mxu0 }
 0x480   :  { %v1826_v44 = vpop.f32.mrf.mxu0 }
 0x498   :  { %v1371_v53 = vpop.f32.mrf.mxu1 }
 0x499   :  { %v1477_v54 = vsel %vm1465_vm12, %v1371_v53, 0.0 }
 0x49a   :  { %v1478_v55 = vadd.f32 %v1477_v54, %v1476_v52  ;;  %v1845_v56 = vpop.f32.mrf.mxu1  ;;  %v1459_v57 = vpop.f32.mrf.mxu0 }
 0x49b   :  { %v1479_v58 = vsel %vm1465_vm12, %v1459_v57, 0.0 }
 0x49c   :  { %v1480_v60 = vadd.f32 %v1479_v58, %v1478_v55  ;;  %v1374_v61 = vpop.f32.mrf.mxu1  ;;  %v1865_v3 = vpop.f32.mrf.mxu0 }
 0x49e   :  { %v1484_v63 = vadd.f32 %v1482_v59, %v1480_v60  ;;  %v1846_v1 = vpop.f32.mrf.mxu1  ;;  %v1462_v2 = vpop.f32.mrf.mxu0 }
 0x4a0   :  { %v1485_v5 = vmax.f32 %v1484_v63, 0.0  ;;  %v1866_v6 = vpop.f32.mrf.mxu0 }
 0x4a2   :  { %v1486_v7 = vpack.c.bf16 %v1485_v5, %v1485_v5 }
 0x4a4   :  { %1872 = vmatmul.mubr.msk.bf16.vlgmr.msra.gmra.mxu1 %vm1503_vm13, %v1486_v7 }
 0x564   :  { %v1541_v9 = vpop.f32.mrf.mxu1 }
 0x565   :  { %v1542_v10 = vadd.f32 %v1541_v9, %v22_v8 }
 0x566   :  { %v1873_v62 = vpop.f32.mrf.mxu1 }
 0x567   :  { %1547 = vst [vmem:[%s2451_s5] sm:$0x3] %v1542_v10 }
 0x568   :  { %v1544_v11 = vpop.f32.mrf.mxu1 }
 0x56a   :  { %v1874_v13 = vpop.f32.mrf.mxu1 }

</bundles_post_ra>
